<compile_context>
chip_gen: v7x
topology: tpu7x:2x2x1
jax: 0.10.0
libtpu: 0.0.40
codegen_flags: <defaults>
</compile_context>

<pallas_src>
import jax
import jax.numpy as jnp
from jax import lax
from jax.experimental import pallas as pl
from jax.experimental.pallas import tpu as pltpu


# ----------------------------- forward (identity) ----------------------------
def crf_forward(x):
    # CRF.forward simply returns its input; no kernel needed.
    return x


# --------------------------------- loss kernel --------------------------------
def crf_loss_kernel(pred_ref, labels_ref, lens_ref, trans_ref, colsum_ref,
                    out_ref):
    # pred_ref   (T, C, TB) f32   labels_ref (T, 1, TB) i32   lens_ref (1, TB) i32
    # trans_ref  (C, C, 1)  f32   colsum_ref (C, 1)     f32
    # out_ref    (1, TB)    f32   (per-example loss for this batch tile)
    T, C, TB = pred_ref.shape

    lens = lens_ref[...]                     # (1, TB) int32
    trans_bc = trans_ref[...]                # (C, C, 1), trans[r, c] on sublane c
    colsum = colsum_ref[...]                 # (C, 1),   sum_r trans[r, c]

    # Hoisted loop invariants (fori_loop body is traced once -> no re-broadcast).
    class_iota = lax.broadcasted_iota(jnp.int32, (C, TB), 0)     # (C, TB)

    def one_hot_t(lab):
        # lab (1, TB) int32 -> (C, TB) f32 ; pad label == C maps to all-zeros,
        # which reproduces one_hot(...)[..., :-1] of the reference.
        return (lab == class_iota).astype(jnp.float32)

    # ---- t = 0 ---------------------------------------------------------------
    emit0 = pred_ref[0]                                           # (C, TB)
    oh0 = one_hot_t(labels_ref[0])                                # (C, TB)
    zsum0 = jnp.sum(emit0, axis=0, keepdims=True)                 # (1, TB)
    sh0 = jnp.sum(emit0 * oh0, axis=0, keepdims=True)             # (1, TB)
    cs0 = jnp.sum(oh0 * colsum, axis=0, keepdims=True)            # (1, TB)
    sg0 = jnp.zeros((1, TB), jnp.float32)

    # ---- serial recurrence over T, batch on lanes ----------------------------
    # Per step (when lens[b] >= t):
    #   z[r, b] += logsumexp_c(pred[t, c, b] + trans[r, c])
    # and only sum_r z is needed at the end, so a (1, TB) accumulator suffices.
    def step(t, carry):
        zsum, sh, sg, cs_prev = carry
        emit = pred_ref[t]                                        # (C, TB)
        oh = one_hot_t(labels_ref[t])                             # (C, TB)

        # score sums, streamed in the same pass over pred
        sh = sh + jnp.sum(emit * oh, axis=0, keepdims=True)
        valid = jnp.sum(oh, axis=0, keepdims=True)                # (1, TB)
        sg = sg + cs_prev * valid
        cs = jnp.sum(oh * colsum, axis=0, keepdims=True)

        # masked log-sum-exp recurrence
        active = (lens >= t).astype(jnp.float32)                  # (1, TB)
        s = emit[None, :, :] + trans_bc                           # (C, C, TB)
        m = jnp.max(s, axis=1, keepdims=True)                     # (C, 1, TB)
        lse = m + jnp.log(jnp.sum(jnp.exp(s - m), axis=1, keepdims=True))
        zsum = zsum + active * jnp.sum(lse, axis=0)               # (1, TB)
        return zsum, sh, sg, cs

    zsum, sh, sg, _ = lax.fori_loop(1, T, step, (zsum0, sh0, sg0, cs0))

    # Reference finishes with Z_t = Z_t_col broadcast over C -> sum = C * sum_r z.
    out_ref[...] = float(C) * zsum - sh - sg


def crf_loss(target_predict, target_true, lens, trans, *, block_b=128):
    """target_predict (B,T,C) f32; target_true (B,T) int; lens (B,) int; trans (C,C)."""
    B, T, C = target_predict.shape

    labels = jnp.asarray(target_true, jnp.int32)
    lens_i = jnp.asarray(lens, jnp.int32)
    trans_f = jnp.asarray(trans, jnp.float32)

    # Batch tile on the lane axis. Tiny batches keep the whole batch in one block.
    tb = B if B < block_b else block_b
    bp = ((B + tb - 1) // tb) * tb

    # Re-layout so batch is the minor (128-lane) axis.
    pred_t = jnp.transpose(target_predict.astype(jnp.float32), (1, 2, 0))   # (T, C, B)
    labels_t = jnp.transpose(labels, (1, 0))[:, None, :]                    # (T, 1, B)
    lens2 = lens_i[None, :]                                                 # (1, B)

    if bp != B:  # pad batch lanes; pad class C -> all-zero one-hot, lens 0 -> inactive
        pad = bp - B
        pred_t = jnp.pad(pred_t, ((0, 0), (0, 0), (0, pad)))
        labels_t = jnp.pad(labels_t, ((0, 0), (0, 0), (0, pad)), constant_values=C)
        lens2 = jnp.pad(lens2, ((0, 0), (0, pad)))

    trans3 = trans_f[:, :, None]                                            # (C, C, 1)
    colsum2 = jnp.sum(trans_f, axis=0)[:, None]                             # (C, 1)

    out = pl.pallas_call(
        crf_loss_kernel,
        out_shape=jax.ShapeDtypeStruct((1, bp), jnp.float32),
        grid=(bp // tb,),
        in_specs=[
            pl.BlockSpec((T, C, tb), lambda i: (0, 0, i)),
            pl.BlockSpec((T, 1, tb), lambda i: (0, 0, i)),
            pl.BlockSpec((1, tb), lambda i: (0, i)),
            pl.BlockSpec((C, C, 1), lambda i: (0, 0, 0)),
            pl.BlockSpec((C, 1), lambda i: (0, 0)),
        ],
        out_specs=pl.BlockSpec((1, tb), lambda i: (0, i)),
        compiler_params=pltpu.CompilerParams(
            dimension_semantics=("parallel",)),  # batch tiles -> megacore on v7x
    )(pred_t, labels_t, lens2, trans3, colsum2)

    return jnp.mean(out[0, :B])


# --------------------------- pure-JAX reference (check) -----------------------
def crf_loss_ref(pred, labels, lens, trans):
    B, T, C = pred.shape
    oneh = jax.nn.one_hot(labels, C + 1, dtype=jnp.float32)[:, :, :-1]
    sum_h = jnp.sum(pred * oneh, axis=(1, 2))
    pre = oneh[:, :-1, :, None]
    fut = oneh[:, 1:, None, :]
    trans_tag = pre @ fut
    g = jnp.matmul(trans, trans_tag)
    sum_g = jnp.sum(g, axis=(1, 2, 3))
    lens_f = jnp.asarray(lens, jnp.float32)
    z_col = pred[:, 0, :, None]
    z_t = jnp.repeat(z_col, C, axis=2)
    for i in range(1, T):
        coe = pred[:, i, None, :] + trans[None]
        mask = jnp.where(lens_f < i, 0.0, 1.0)[:, None, None]
        z_t = z_t + coe * mask
        z_sum = jax.scipy.special.logsumexp(z_t, axis=2, keepdims=True)
        z_col = jnp.where(lens_f[:, None, None] < i, z_col, z_sum)
        z_t = jnp.repeat(z_col, C, axis=2)
    sum_z = jnp.sum(z_t, axis=(1, 2))
    return jnp.mean(sum_z - sum_h - sum_g)


if __name__ == "__main__":
    # ---- small test: B=2, T=8, C=4 (single batch tile) -----------------------
    B, T, C = 2, 8, 4
    key = jax.random.PRNGKey(0)
    k_pred, k_lab, k_trans, k2 = jax.random.split(key, 4)

    trans = jax.random.uniform(k_trans, (C, C), dtype=jnp.float32)
    target_predict = jax.random.normal(k_pred, (B, T, C), dtype=jnp.float32)
    labels = jax.random.randint(k_lab, (B, T), 0, C)
    lens = jnp.array([T, 5], dtype=jnp.int32)
    pad_mask = jnp.arange(T)[None, :] >= lens[:, None]
    labels = jnp.where(pad_mask, C, labels)

    # forward pass (identity)
    y = crf_forward(target_predict)
    jax.block_until_ready(y)
    assert jnp.array_equal(y, target_predict)

    loss = crf_loss(target_predict, labels, lens, trans)
    jax.block_until_ready(loss)
    ref = crf_loss_ref(target_predict, labels, lens, trans)
    assert jnp.allclose(loss, ref, atol=1e-4, rtol=1e-4), (loss, ref)

    # ---- larger test: exercises batch tiling + lane padding (grid=(2,)) ------
    B2, T2 = 130, 12
    k_p2, k_l2, k_len2 = jax.random.split(k2, 3)
    pred2 = jax.random.normal(k_p2, (B2, T2, C), dtype=jnp.float32)
    lens2 = jax.random.randint(k_len2, (B2,), 1, T2 + 1)
    labels2 = jax.random.randint(k_l2, (B2, T2), 0, C)
    labels2 = jnp.where(jnp.arange(T2)[None, :] >= lens2[:, None], C, labels2)

    loss2 = crf_loss(pred2, labels2, lens2, trans)
    jax.block_until_ready(loss2)
    ref2 = crf_loss_ref(pred2, labels2, lens2, trans)
    assert jnp.allclose(loss2, ref2, atol=1e-4, rtol=1e-4), (loss2, ref2)

    print("KERNEL_OK")
</pallas_src>

<mosaic_0001>
module attributes {stable_mosaic.version = 11 : i64} {
  func.func @crf_loss_kernel(%arg0: i32, %arg1: memref<8x4x2xf32, #tpu.memory_space<vmem>>, %arg2: memref<8x1x2xi32, #tpu.memory_space<vmem>>, %arg3: memref<1x2xi32, #tpu.memory_space<vmem>>, %arg4: memref<4x4x1xf32, #tpu.memory_space<vmem>>, %arg5: memref<4x1xf32, #tpu.memory_space<vmem>>, %arg6: memref<1x2xf32, #tpu.memory_space<vmem>>) attributes {dimension_semantics = [#tpu.dimension_semantics<parallel>], iteration_bounds = array<i64: 1>, scalar_prefetch = 0 : i64, scratch_operands = 0 : i64, tpu.core_type = #tpu.core_type<tc>, window_params = [{transform_indices = @transform_0, window_bounds = array<i64: 8, 4, 2>}, {transform_indices = @transform_1, window_bounds = array<i64: 8, 1, 2>}, {transform_indices = @transform_2, window_bounds = array<i64: 1, 2>}, {pipeline_mode = #tpu.pipeline_mode<synchronous>, transform_indices = @transform_3, window_bounds = array<i64: 4, 4, 1>}, {pipeline_mode = #tpu.pipeline_mode<synchronous>, transform_indices = @transform_4, window_bounds = array<i64: 4, 1>}, {transform_indices = @transform_5, window_bounds = array<i64: 1, 2>}]} {
    %c0 = arith.constant 0 : index
    %c0_0 = arith.constant 0 : index
    %0 = vector.load %arg3[%c0, %c0_0] : memref<1x2xi32, #tpu.memory_space<vmem>>, vector<1x2xi32>
    %c0_1 = arith.constant 0 : index
    %c0_2 = arith.constant 0 : index
    %c0_3 = arith.constant 0 : index
    %1 = vector.load %arg4[%c0_1, %c0_2, %c0_3] : memref<4x4x1xf32, #tpu.memory_space<vmem>>, vector<4x4x1xf32>
    %c0_4 = arith.constant 0 : index
    %c0_5 = arith.constant 0 : index
    %2 = vector.load %arg5[%c0_4, %c0_5] : memref<4x1xf32, #tpu.memory_space<vmem>>, vector<4x1xf32>
    %3 = tpu.iota {dimensions = array<i32: 0>} : vector<4x2xi32>
    %c0_6 = arith.constant 0 : index
    %c0_7 = arith.constant 0 : index
    %c0_8 = arith.constant 0 : index
    %4 = vector.load %arg1[%c0_6, %c0_7, %c0_8] : memref<8x4x2xf32, #tpu.memory_space<vmem>>, vector<1x4x2xf32>
    %5 = vector.shape_cast %4 : vector<1x4x2xf32> to vector<4x2xf32>
    %c0_9 = arith.constant 0 : index
    %c0_10 = arith.constant 0 : index
    %c0_11 = arith.constant 0 : index
    %6 = vector.load %arg2[%c0_9, %c0_10, %c0_11] : memref<8x1x2xi32, #tpu.memory_space<vmem>>, vector<1x1x2xi32>
    %7 = vector.shape_cast %6 : vector<1x1x2xi32> to vector<1x2xi32>
    %8 = vector.broadcast %7 : vector<1x2xi32> to vector<4x2xi32>
    %9 = arith.cmpi eq, %8, %3 : vector<4x2xi32>
    %10 = arith.extui %9 : vector<4x2xi1> to vector<4x2xi32>
    %11 = arith.sitofp %10 : vector<4x2xi32> to vector<4x2xf32>
    %cst = arith.constant dense<0.000000e+00> : vector<2xf32>
    %12 = vector.multi_reduction <add>, %5, %cst [0] : vector<4x2xf32> to vector<2xf32>
    %13 = vector.shape_cast %12 : vector<2xf32> to vector<1x2xf32>
    %14 = arith.mulf %5, %11 : vector<4x2xf32>
    %cst_12 = arith.constant dense<0.000000e+00> : vector<2xf32>
    %15 = vector.multi_reduction <add>, %14, %cst_12 [0] : vector<4x2xf32> to vector<2xf32>
    %16 = vector.shape_cast %15 : vector<2xf32> to vector<1x2xf32>
    %17 = vector.broadcast %2 : vector<4x1xf32> to vector<4x2xf32>
    %18 = arith.mulf %11, %17 : vector<4x2xf32>
    %cst_13 = arith.constant dense<0.000000e+00> : vector<2xf32>
    %19 = vector.multi_reduction <add>, %18, %cst_13 [0] : vector<4x2xf32> to vector<2xf32>
    %20 = vector.shape_cast %19 : vector<2xf32> to vector<1x2xf32>
    %cst_14 = arith.constant 0.000000e+00 : f32
    %21 = vector.broadcast %cst_14 : f32 to vector<1x2xf32>
    %c1_i32 = arith.constant 1 : i32
    %c7_i32 = arith.constant 7 : i32
    %22 = arith.addi %c1_i32, %c7_i32 : i32
    %c1_i32_15 = arith.constant 1 : i32
    %23:4 = scf.for %arg7 = %c1_i32 to %22 step %c1_i32_15 iter_args(%arg8 = %13, %arg9 = %16, %arg10 = %21, %arg11 = %20) -> (vector<1x2xf32>, vector<1x2xf32>, vector<1x2xf32>, vector<1x2xf32>)  : i32 {
      %29 = arith.index_cast %arg7 : i32 to index
      %c0_20 = arith.constant 0 : index
      %c0_21 = arith.constant 0 : index
      %30 = vector.load %arg1[%29, %c0_20, %c0_21] : memref<8x4x2xf32, #tpu.memory_space<vmem>>, vector<1x4x2xf32>
      %31 = vector.shape_cast %30 : vector<1x4x2xf32> to vector<4x2xf32>
      %32 = arith.index_cast %arg7 : i32 to index
      %c0_22 = arith.constant 0 : index
      %c0_23 = arith.constant 0 : index
      %33 = vector.load %arg2[%32, %c0_22, %c0_23] : memref<8x1x2xi32, #tpu.memory_space<vmem>>, vector<1x1x2xi32>
      %34 = vector.shape_cast %33 : vector<1x1x2xi32> to vector<1x2xi32>
      %35 = vector.broadcast %34 : vector<1x2xi32> to vector<4x2xi32>
      %36 = arith.cmpi eq, %35, %3 : vector<4x2xi32>
      %37 = arith.extui %36 : vector<4x2xi1> to vector<4x2xi32>
      %38 = arith.sitofp %37 : vector<4x2xi32> to vector<4x2xf32>
      %39 = arith.mulf %31, %38 : vector<4x2xf32>
      %cst_24 = arith.constant dense<0.000000e+00> : vector<2xf32>
      %40 = vector.multi_reduction <add>, %39, %cst_24 [0] : vector<4x2xf32> to vector<2xf32>
      %41 = vector.shape_cast %40 : vector<2xf32> to vector<1x2xf32>
      %42 = arith.addf %arg9, %41 : vector<1x2xf32>
      %cst_25 = arith.constant dense<0.000000e+00> : vector<2xf32>
      %43 = vector.multi_reduction <add>, %38, %cst_25 [0] : vector<4x2xf32> to vector<2xf32>
      %44 = vector.shape_cast %43 : vector<2xf32> to vector<1x2xf32>
      %45 = arith.mulf %arg11, %44 : vector<1x2xf32>
      %46 = arith.addf %arg10, %45 : vector<1x2xf32>
      %47 = vector.broadcast %2 : vector<4x1xf32> to vector<4x2xf32>
      %48 = arith.mulf %38, %47 : vector<4x2xf32>
      %cst_26 = arith.constant dense<0.000000e+00> : vector<2xf32>
      %49 = vector.multi_reduction <add>, %48, %cst_26 [0] : vector<4x2xf32> to vector<2xf32>
      %50 = vector.shape_cast %49 : vector<2xf32> to vector<1x2xf32>
      %51 = vector.broadcast %arg7 : i32 to vector<1x2xi32>
      %52 = arith.cmpi sge, %0, %51 : vector<1x2xi32>
      %53 = arith.extui %52 : vector<1x2xi1> to vector<1x2xi32>
      %54 = arith.sitofp %53 : vector<1x2xi32> to vector<1x2xf32>
      %55 = vector.shape_cast %31 : vector<4x2xf32> to vector<1x4x2xf32>
      %56 = vector.broadcast %55 : vector<1x4x2xf32> to vector<4x4x2xf32>
      %57 = vector.broadcast %1 : vector<4x4x1xf32> to vector<4x4x2xf32>
      %58 = arith.addf %56, %57 : vector<4x4x2xf32>
      %cst_27 = arith.constant dense<0xFF800000> : vector<4x2xf32>
      %59 = vector.multi_reduction <maximumf>, %58, %cst_27 [1] : vector<4x4x2xf32> to vector<4x2xf32>
      %60 = vector.shape_cast %59 : vector<4x2xf32> to vector<4x1x2xf32>
      %61 = vector.broadcast %60 : vector<4x1x2xf32> to vector<4x4x2xf32>
      %62 = arith.subf %58, %61 : vector<4x4x2xf32>
      %63 = math.exp %62 : vector<4x4x2xf32>
      %cst_28 = arith.constant dense<0.000000e+00> : vector<4x2xf32>
      %64 = vector.multi_reduction <add>, %63, %cst_28 [1] : vector<4x4x2xf32> to vector<4x2xf32>
      %65 = vector.shape_cast %64 : vector<4x2xf32> to vector<4x1x2xf32>
      %66 = math.log %65 : vector<4x1x2xf32>
      %67 = arith.addf %60, %66 : vector<4x1x2xf32>
      %cst_29 = arith.constant dense<0.000000e+00> : vector<1x2xf32>
      %68 = vector.multi_reduction <add>, %67, %cst_29 [0] : vector<4x1x2xf32> to vector<1x2xf32>
      %69 = arith.mulf %54, %68 : vector<1x2xf32>
      %70 = arith.addf %arg8, %69 : vector<1x2xf32>
      scf.yield %70, %42, %46, %50 : vector<1x2xf32>, vector<1x2xf32>, vector<1x2xf32>, vector<1x2xf32>
    }
    %c7_i32_16 = arith.constant 7 : i32
    %cst_17 = arith.constant 4.000000e+00 : f32
    %24 = vector.broadcast %cst_17 : f32 to vector<1x2xf32>
    %25 = arith.mulf %24, %23#0 : vector<1x2xf32>
    %26 = arith.subf %25, %23#1 : vector<1x2xf32>
    %27 = arith.subf %26, %23#2 : vector<1x2xf32>
    %c0_18 = arith.constant 0 : index
    %c0_19 = arith.constant 0 : index
    %28 = vector.load %arg6[%c0_18, %c0_19] : memref<1x2xf32, #tpu.memory_space<vmem>>, vector<1x2xf32>
    tpu.vector_store %arg6[%c0_18, %c0_19], %27 {strides = array<i32>} : memref<1x2xf32, #tpu.memory_space<vmem>>, vector<1x2xf32>,
    return
  }
  func.func @transform_0(%arg0: i32) -> (i32, i32, i32) {
    %c0_i32 = arith.constant 0 : i32
    %c0_i32_0 = arith.constant 0 : i32
    %c0_i32_1 = arith.constant 0 : i32
    return %c0_i32, %c0_i32_0, %arg0 : i32, i32, i32
  }
  func.func @transform_1(%arg0: i32) -> (i32, i32, i32) {
    %c0_i32 = arith.constant 0 : i32
    %c0_i32_0 = arith.constant 0 : i32
    %c0_i32_1 = arith.constant 0 : i32
    return %c0_i32, %c0_i32_0, %arg0 : i32, i32, i32
  }
  func.func @transform_2(%arg0: i32) -> (i32, i32) {
    %c0_i32 = arith.constant 0 : i32
    %c0_i32_0 = arith.constant 0 : i32
    return %c0_i32, %arg0 : i32, i32
  }
  func.func @transform_3(%arg0: i32) -> (i32, i32, i32) {
    %c0_i32 = arith.constant 0 : i32
    %c0_i32_0 = arith.constant 0 : i32
    %c0_i32_1 = arith.constant 0 : i32
    %c0_i32_2 = arith.constant 0 : i32
    return %c0_i32, %c0_i32_0, %c0_i32_1 : i32, i32, i32
  }
  func.func @transform_4(%arg0: i32) -> (i32, i32) {
    %c0_i32 = arith.constant 0 : i32
    %c0_i32_0 = arith.constant 0 : i32
    %c0_i32_1 = arith.constant 0 : i32
    return %c0_i32, %c0_i32_0 : i32, i32
  }
  func.func @transform_5(%arg0: i32) -> (i32, i32) {
    %c0_i32 = arith.constant 0 : i32
    %c0_i32_0 = arith.constant 0 : i32
    return %c0_i32, %arg0 : i32, i32
  }
}

</mosaic_0001>

<bundles_post_ra>
// kernel: tpu_custom_call.1
= control target key start
LH: loop header
LB: loop body
LE: loop exit
PB: predicated region body
PF: predicated region fallthrough
CT: control target
= control target key end

     0   :  { %v27_v1 = vlaneseq  ;;  %v406_v3 = vmov 0   ;;  %vm38_vm0 = vcmask 11264   ;;  %s571_s0 = inlined_call_operand.vmem [shape: f32[8,4,2], index: 0, kind: input, shape index: {}]   ;;  %s572_s1 = inlined_call_operand.vmem [shape: s32[8,1,2], index: 1, kind: input, shape index: {}]   ;;  %s573_s2 = inlined_call_operand.vmem [shape: s32[1,2], index: 2, kind: input, shape index: {}]   ;;  %s574_s3 = inlined_call_operand.vmem [shape: f32[4,4,1], index: 3, kind: input, shape index: {}]   ;;  %s575_s4 = inlined_call_operand.vmem [shape: f32[4,1], index: 4, kind: input, shape index: {}]   ;;  %s576_s5 = inlined_call_operand.hbm [shape: f32[1,2], index: 5, kind: output, shape index: {}]  }
   0x1   :  { %v26_v0 = vld [vmem:[%s575_s4] sm:$0xf]  ;;  %323 = vset.pattern.permute.xlu0 %v406_v3 }
   0x2   :  { %v29_v2 = vld [vmem:[%s571_s0] sm:$0xf] }
   0x3   :  { %v272_v4 = vld [vmem:[%s572_s1] ss:$0 sm:$0xff] }
   0x4   :  { %10 = vsyncpa [#allocation3], 0  ;;  %56 = vperm.xlu0 %323, %v26_v0   ;;  %v450_v5 = vshrl.u32 %v27_v1, 7  ;;  %v39_v6 = vsel %vm38_vm0, %v29_v2, 0.0  ;;  %v407_v8 = vmov 0.0   ;;  %v486_v37 = vmov 0.0  }
   0x5   :  { %v40_v7 = vrot.slane %v39_v6, 4  ;;  %v458_v21 = vld [vmem:[%s573_s2] sm:$0x1]  ;;  %v468_v23 = vld [vmem:[%s574_s3 + $0x4] sm:$0xf]  ;;  %s492_s2 = smov 1  }
   0x6   :  { %vm35_vm1 = vcmp.eq.s32.totalorder %v272_v4, %v450_v5  ;;  %v463_v22 = vld [vmem:[%s574_s3] sm:$0xf]  ;;  %v473_v24 = vld [vmem:[%s574_s3 + $0x8] sm:$0xf]  ;;  %v478_v25 = vld [vmem:[%s574_s3 + $0xc] sm:$0xf] }
   0x7   :  { %v273_v9 = vsel %vm35_vm1, 1.0, %v407_v8  ;;  %v41_v10 = vadd.f32 %v40_v7, %v39_v6 }
   0x8   :  { %v46_v11 = vmul.f32 %v273_v9, %v29_v2 }
   0x9   :  { %v42_v12 = vrot.slane %v41_v10, 2 }
   0xa   :  { %v47_v13 = vsel %vm38_vm0, %v46_v11, 0.0 }
   0xb   :  { %v43_v14 = vadd.f32 %v42_v12, %v41_v10  ;;  %v48_v15 = vrot.slane %v47_v13, 4 }
   0xd   :  { %v44_v16 = vrot.slane %v43_v14, 1  ;;  %v49_v17 = vadd.f32 %v48_v15, %v47_v13 }
   0xf   :  { %v45_v18 = vadd.f32 %v44_v16, %v43_v14   ;;  %v50_v19 = vrot.slane %v49_v17, 2 }
  0x11   :  { %v51_v20 = vadd.f32 %v50_v19, %v49_v17 }
  0x13   :  { %v52_v26 = vrot.slane %v51_v20, 1 }
  0x15   :  { %v53_v27 = vadd.f32 %v52_v26, %v51_v20  }
  0x83   :  { %v480_v28 = vpop.permute.xlu0 %56 }
  0x84   :  { %v59_v29 = vmul.f32 %v273_v9, %v480_v28 }
  0x86   :  { %v60_v30 = vsel %vm38_vm0, %v59_v29, 0.0 }
  0x87   :  { %v61_v31 = vrot.slane %v60_v30, 4 }
  0x89   :  { %v62_v32 = vadd.f32 %v61_v31, %v60_v30 }
  0x8b   :  { %v63_v33 = vrot.slane %v62_v32, 2 }
  0x8d   :  { %v64_v34 = vadd.f32 %v63_v33, %v62_v32 }
  0x8f   :  { %v65_v35 = vrot.slane %v64_v34, 1 }
  0x91   :  { %v66_v36 = vadd.f32 %v65_v35, %v64_v34  }
  0x92 LB: > { %v408_v38 = vmov 0   ;;  %s274_s3 = sshll.u32 %s404_s2, 2  ;;  %s80_s10 = scalar_lea.vmem %s572_s1, %s404_s2  ;;  %v409_v41 = vmov 0.0   ;;  %vm223_vm3 = vcmask 15360   ;;  %s404_s2 = sphi %s492_s2, %s72_s2   ;;  %v400_v18 = vphi %v45_v18, %v581_v18   ;;  %v396_v27 = vphi %v53_v27, %v580_v27   ;;  %v392_v37 = vphi %v486_v37, %v579_v37   ;;  %v388_v36 = vphi %v66_v36, %v521_v36  }
  0x93   : > { %325 = vset.pattern.permute.xlu1 %v408_v38  ;;  %324 = vset.pattern.permute.xlu0 %v408_v38  ;;  %s78_s13 = scalar_lea.vmem %s571_s0, %s274_s3  ;;  %v275_v39 = vld [vmem:[%s80_s10] ss:$0 sm:$0xff] }
  0x94   : > { %131 = vperm.xlu1 %325, %v473_v24   ;;  %121 = vperm.xlu0 %324, %v463_v22   ;;  %vm86_vm2 = vcmp.eq.s32.totalorder %v275_v39, %v450_v5  ;;  %v79_v40 = vld [vmem:[%s78_s13] sm:$0xf] }
  0x95   : > { %v276_v42 = vsel %vm86_vm2, 1.0, %v409_v41 }
  0x96   : > { %v89_v43 = vmul.f32 %v276_v42, %v79_v40  ;;  %v98_v44 = vsel %vm38_vm0, %v276_v42, 0.0  ;;  %v107_v45 = vmul.f32 %v276_v42, %v480_v28 }
  0x97   : > { %v99_v46 = vrot.slane %v98_v44, 4 }
  0x98   : > { %136 = vperm.xlu1 %325, %v478_v25   ;;  %126 = vperm.xlu0 %324, %v468_v23   ;;  %v90_v47 = vsel %vm38_vm0, %v89_v43, 0.0  ;;  %v108_v48 = vsel %vm38_vm0, %v107_v45, 0.0 }
  0x99   : > { %v91_v49 = vrot.slane %v90_v47, 4  ;;  %v100_v50 = vadd.f32 %v99_v46, %v98_v44  ;;  %v109_v51 = vrot.slane %v108_v48, 4 }
  0x9b   : > { %v92_v52 = vadd.f32 %v91_v49, %v90_v47  ;;  %v101_v53 = vrot.slane %v100_v50, 2  ;;  %v110_v54 = vadd.f32 %v109_v51, %v108_v48 }
  0x9d   : > { %v93_v55 = vrot.slane %v92_v52, 2  ;;  %v102_v56 = vadd.f32 %v101_v53, %v100_v50  ;;  %v111_v57 = vrot.slane %v110_v54, 2 }
  0x9f   : > { %v94_v58 = vadd.f32 %v93_v55, %v92_v52  ;;  %v103_v59 = vrot.slane %v102_v56, 1  ;;  %v112_v60 = vadd.f32 %v111_v57, %v110_v54 }
  0xa1   : > { %v95_v61 = vrot.slane %v94_v58, 1  ;;  %v104_v62 = vadd.f32 %v103_v59, %v102_v56  ;;  %v113_v63 = vrot.slane %v112_v60, 1 }
  0xa3   : > { %v96_v0 = vadd.f32 %v95_v61, %v94_v58  ;;  %v105_v1 = vmul.f32 %v388_v36, %v104_v62  ;;  %v521_v36 = vadd.f32 %v113_v63, %v112_v60  }
  0xa5   : > { %v523_v27 = vadd.f32 %v396_v27, %v96_v0   ;;  %v525_v37 = vadd.f32 %v392_v37, %v105_v1  }
  0xa7   : > { %v577_v2 = vmov %v523_v27  ;;  %v578_v3 = vmov %v525_v37 }
 0x113   : > { %v132_v4 = vpop.permute.xlu1 %131  ;;  %v122_v6 = vpop.permute.xlu0 %121 }
 0x114   : > { %v141_v7 = vadd.f32 %v132_v4, %v79_v40  ;;  %v139_v8 = vadd.f32 %v122_v6, %v79_v40 }
 0x116   : > { %v157_v9 = vsel %vm38_vm0, %v141_v7, -inf  ;;  %v143_v10 = vsel %vm38_vm0, %v139_v8, -inf }
 0x117   : > { %v158_v11 = vrot.slane %v157_v9, 4  ;;  %v144_v12 = vrot.slane %v143_v10, 4  ;;  %v137_v13 = vpop.permute.xlu1 %136  ;;  %v127_v14 = vpop.permute.xlu0 %126 }
 0x118   : > { %v142_v15 = vadd.f32 %v137_v13, %v79_v40  ;;  %v140_v16 = vadd.f32 %v127_v14, %v79_v40 }
 0x119   : > { %v159_v17 = vmax.f32 %v157_v9, %v158_v11  ;;  %v145_v19 = vmax.f32 %v143_v10, %v144_v12 }
 0x11a   : > { %v164_v20 = vsel %vm38_vm0, %v142_v15, -inf  ;;  %v150_v26 = vsel %vm38_vm0, %v140_v16, -inf }
 0x11b   : > { %v160_v27 = vrot.slane %v159_v17, 2  ;;  %v146_v29 = vrot.slane %v145_v19, 2  ;;  %v165_v30 = vrot.slane %v164_v20, 4  ;;  %v151_v31 = vrot.slane %v150_v26, 4 }
 0x11d   : > { %v161_v32 = vmax.f32 %v159_v17, %v160_v27  ;;  %v147_v33 = vmax.f32 %v145_v19, %v146_v29  ;;  %v166_v34 = vmax.f32 %v164_v20, %v165_v30  ;;  %v152_v35 = vmax.f32 %v150_v26, %v151_v31 }
 0x11f   : > { %v162_v37 = vrot.slane %v161_v32, 1  ;;  %v148_v38 = vrot.slane %v147_v33, 1  ;;  %v167_v39 = vrot.slane %v166_v34, 2  ;;  %v153_v42 = vrot.slane %v152_v35, 2 }
 0x121   : > { %v531_v43 = vmax.f32 %v161_v32, %v162_v37  ;;  %v149_v40 = vmax.f32 %v147_v33, %v148_v38  ;;  %v168_v44 = vmax.f32 %v166_v34, %v167_v39  ;;  %v154_v45 = vmax.f32 %v152_v35, %v153_v42 }
 0x123   : > { %v173_v46 = vsub.f32 %v141_v7, %v531_v43  ;;  %v171_v47 = vsub.f32 %v139_v8, %v149_v40  ;;  %v169_v48 = vrot.slane %v168_v44, 1  ;;  %v155_v49 = vrot.slane %v154_v45, 1 }
 0x125   : > { %v179_v50 = vmul.f32 1.442695, %v173_v46  ;;  %v175_v51 = vmul.f32 1.442695, %v171_v47  ;;  %v170_v52 = vmax.f32 %v168_v44, %v169_v48  ;;  %v156_v53 = vmax.f32 %v154_v45, %v155_v49 }
 0x126   : > { %v115_v49 = vstv %s404_s2  ;;  %s72_s2 = sadd.s32 1, %s404_s2  }
 0x127   : > { %326 = vpow2.f32 %v179_v50  ;;  %v174_v54 = vsub.f32 %v142_v15, %v170_v52  ;;  %v172_v55 = vsub.f32 %v140_v16, %v156_v53  ;;  %vm116_vm4 = vcmp.ge.s32.totalorder %v458_v21, %v115_v49  ;;  %p69_p0 = scmp.ge.s32.totalorder %s72_s2, 8  }
 0x128   : > { %328 = vpow2.f32 %v175_v51  ;;  %s410_s14 = smov (%p69_p0), [#allocation2]   ;;  %vm236_vm5 = vcmask (%p69_p0), 8192  }
 0x129   : > { %v181_v56 = vmul.f32 1.442695, %v174_v54  ;;  %v177_v57 = vmul.f32 1.442695, %v172_v55  ;;  %s244_s15 = sshll.u32 (%p69_p0), %s410_s14, 4  ;;  %s245_s15 = int_to_ptr.vmem [resolvable:$true] %s244_s15 }
 0x12a   :  { %s342_s16 = scalar_lea.vmem (%p69_p0), %s245_s15, 16  ;;  %s346_s17 = scalar_lea.vmem (%p69_p0), %s245_s15, 32 }
 0x12b   : > { %330 = vpow2.f32 %v181_v56  ;;  %p343_p1 = scmp.ne.s32.totalorder (%p69_p0), %s245_s15, %s342_s16  ;;  %p347_p2 = scmp.lt.s32.totalorder (%p69_p0), %s245_s15, %s245_s15 }
 0x12c   : > { %332 = vpow2.f32 %v177_v57  ;;  %p348_p3 = scmp.lt.s32.totalorder (%p69_p0), %s346_s17, %s342_s16 }
 0x12e   :  { %p349_p4 = por (%p69_p0), %p348_p3, %p347_p2 }
 0x130   :  { %p350_p5 = pnand (%p69_p0), %p349_p4, %p343_p1 }
 0x131   : > { %v327_v58 = vpop.eup %326 }
 0x132   : > { %v329_v59 = vpop.eup %328  ;;  %v197_v60 = vsel %vm38_vm0, %v327_v58, 0.0 }
 0x133   : > { %v198_v61 = vrot.slane %v197_v60, 4  ;;  %v183_v62 = vsel %vm38_vm0, %v329_v59, 0.0 }
 0x134   : > { %v184_v63 = vrot.slane %v183_v62, 4 }
 0x135   : > { %v331_v0 = vpop.eup %330  ;;  %v199_v1 = vadd.f32 %v198_v61, %v197_v60  ;;  %v277_v60 = vsel %vm116_vm4, 1.0, %v409_v41 }
 0x136   : > { %v333_v4 = vpop.eup %332  ;;  %v185_v6 = vadd.f32 %v184_v63, %v183_v62  ;;  %v204_v7 = vsel %vm38_vm0, %v331_v0, 0.0 }
 0x137   : > { %v200_v8 = vrot.slane %v199_v1, 2  ;;  %v205_v9 = vrot.slane %v204_v7, 4  ;;  %v190_v10 = vsel %vm38_vm0, %v333_v4, 0.0 }
 0x138   : > { %v186_v11 = vrot.slane %v185_v6, 2  ;;  %v191_v12 = vrot.slane %v190_v10, 4 }
 0x139   : > { %v201_v13 = vadd.f32 %v200_v8, %v199_v1  ;;  %v206_v14 = vadd.f32 %v205_v9, %v204_v7 }
 0x13a   : > { %v187_v15 = vadd.f32 %v186_v11, %v185_v6  ;;  %v192_v16 = vadd.f32 %v191_v12, %v190_v10 }
 0x13b   : > { %v202_v17 = vrot.slane %v201_v13, 1  ;;  %v207_v19 = vrot.slane %v206_v14, 2 }
 0x13c   : > { %v188_v20 = vrot.slane %v187_v15, 1  ;;  %v193_v26 = vrot.slane %v192_v16, 2 }
 0x13d   : > { %v203_v27 = vadd.f32 %v202_v17, %v201_v13  ;;  %v208_v29 = vadd.f32 %v207_v19, %v206_v14 }
 0x13e   : > { %v189_v30 = vadd.f32 %v188_v20, %v187_v15  ;;  %v194_v31 = vadd.f32 %v193_v26, %v192_v16 }
 0x13f   : > { %334 = vlog2.f32 %v203_v27  ;;  %v209_v32 = vrot.slane %v208_v29, 1  ;;  %v580_v27 = vmov %v577_v2 }
 0x140   : > { %336 = vlog2.f32 %v189_v30  ;;  %v195_v33 = vrot.slane %v194_v31, 1 }
 0x141   : > { %v210_v34 = vadd.f32 %v209_v32, %v208_v29 }
 0x142   : > { %v196_v35 = vadd.f32 %v195_v33, %v194_v31 }
 0x143   : > { %338 = vlog2.f32 %v210_v34 }
 0x144   : > { %340 = vlog2.f32 %v196_v35 }
 0x149   : > { %v335_v37 = vpop.eup %334 }
 0x14a   : > { %v337_v38 = vpop.eup %336  ;;  %v216_v44 = vmul.f32 0.6931472, %v335_v37  ;;  %v579_v37 = vmov %v578_v3 }
 0x14b   : > { %v212_v39 = vmul.f32 0.6931472, %v337_v38 }
 0x14c   : > { %v221_v50 = vadd.f32 %v216_v44, %v531_v43 }
 0x14d   : > { %v339_v42 = vpop.eup %338  ;;  %v219_v46 = vadd.f32 %v212_v39, %v149_v40 }
 0x14e   : > { %v341_v45 = vpop.eup %340  ;;  %v218_v47 = vmul.f32 0.6931472, %v339_v42  ;;  %v227_v58 = vsel %vm223_vm3, %v221_v50, 0.0 }
 0x14f   : > { %v214_v48 = vmul.f32 0.6931472, %v341_v45  ;;  %v224_v54 = vsel %vm223_vm3, %v219_v46, 0.0 }
 0x150   : > { %v222_v55 = vadd.f32 %v218_v47, %v170_v52 }
 0x151   : > { %v220_v51 = vadd.f32 %v214_v48, %v156_v53 }
 0x152   : > { %v229_v61 = vsel %vm223_vm3, %v222_v55, 0.0 }
 0x153   : > { %v225_v56 = vsel %vm223_vm3, %v220_v51, 0.0 }
 0x154   : > { %v226_v57 = vadd.f32 %v225_v56, %v224_v54 }
 0x156   : > { %v228_v59 = vadd.f32 %v227_v58, %v226_v57 }
 0x158   : > { %v230_v62 = vadd.f32 %v229_v61, %v228_v59  ;;  %71 = sbr.rel (!%p69_p0) target bundleno = 146 (0x92), region = 49 }
 0x15a   : > { %v231_v40 = vmul.f32 %v277_v60, %v230_v62 }
 0x15c   : > { %v232_v63 = vadd.f32 %v400_v18, %v231_v40  }
 0x15e   : > { %v581_v18 = vmov %v232_v63  ;;  %v233_v41 = vmul.f32 (%p69_p0), 4.0, %v232_v63 }
 0x160   :  { %v234_v18 = vsub.f32 %v233_v41, %v577_v2 }
 0x162   :  { %v235_v43 = vsub.f32 %v234_v18, %v578_v3 }
 0x164   :  { %237 = vst.msk [vmem:[#allocation2] sm:$0x1] %vm236_vm5, %v235_v43 }
 0x165   :  { %353 = shalt.err (!%p350_p5)
}
 0x166   :  { %s354_s0 = scalar_lea.hbm %s576_s5, 16 }
 0x167   :  { %p355_p6 = scmp.ne.s32.totalorder %s576_s5, %s354_s0  ;;  %p358_p7 = scmp.lt.u32.totalorder %s354_s0, %s576_s5 }
 0x169   :  { %p360_p8 = pnand %p358_p7, %p355_p6 }
 0x16b   :  { %363 = shalt.err (!%p360_p8)
}
 0x16c   :  { %247 = dma.vmem_to_hbm [thread:$0]  %s245_s15, 16, %s576_s5, [#allocation3]  }
 0x16d   :  { %384 = dma.done.wait [#allocation3], 16  }
 0x16e   :  { %385 = vsyncadd [#allocation3], 4294967280 }
 0x16f   :  { %251 = vsyncpa [#allocation3], 1 }

</bundles_post_ra>
